<compile_context>
chip_gen: v6e
topology: v6e:2x2x1
jax: 0.10.0
libtpu: 0.0.40
codegen_flags: <defaults>
</compile_context>

<pallas_src>
import math

import jax
import jax.numpy as jnp
from jax.experimental import pallas as pl
from jax.experimental.pallas import tpu as pltpu

_SQRT_2_OVER_PI = math.sqrt(2.0 / math.pi)


def feed_forward_kernel(x_ref, w1_ref, b1_ref, w2_ref, b2_ref, o_ref, acc_ref):
    # x_ref:  (row_tile, emb)      w1_ref: (emb, h_tile)   b1_ref: (1, h_tile)
    # w2_ref: (h_tile, emb)        b2_ref: (1, emb)
    # o_ref:  (row_tile, emb)      acc_ref: (row_tile, emb) f32 scratch
    j = pl.program_id(1)

    @pl.when(j == 0)
    def _():
        acc_ref[...] = jnp.zeros_like(acc_ref)

    # Default MXU precision (single-pass), f32 accumulation. HIGHEST forced a
    # 3-6x multi-pass emulation and was the dominant compute cost.
    x = x_ref[...].astype(w1_ref.dtype)
    h = jnp.dot(x, w1_ref[...], preferred_element_type=jnp.float32)
    h = h + b1_ref[...].astype(jnp.float32)

    # tanh-approximation GELU (matches the PyTorch GELU module exactly).
    h = 0.5 * h * (1.0 + jnp.tanh(_SQRT_2_OVER_PI * (h + 0.044715 * (h * h * h))))

    acc_ref[...] += jnp.dot(
        h.astype(w2_ref.dtype), w2_ref[...], preferred_element_type=jnp.float32
    )

    @pl.when(j == pl.num_programs(1) - 1)
    def _():
        o_ref[...] = (acc_ref[...] + b2_ref[...].astype(jnp.float32)).astype(o_ref.dtype)


def _sublane_multiple(dtype) -> int:
    bits = jnp.dtype(dtype).itemsize * 8
    if bits >= 32:
        return 8
    if bits == 16:
        return 16
    return 32


def _vmem_capacity_bytes() -> int:
    """Physical VMEM per TensorCore; conservative 64 MiB (v7x) if unknown."""
    try:
        info = pltpu.get_tpu_info()
        cap = int(getattr(info, "vmem_capacity_bytes", 0))
        if cap > 0:
            return cap
    except Exception:
        pass
    return 64 * 1024 * 1024


def _h_tile_candidates(hidden: int):
    """Lane-dense (multiple-of-128) exact divisors of hidden, descending."""
    cands = {hidden}
    for t in range(128, hidden, 128):
        if hidden % t == 0:
            cands.add(t)
    return sorted(cands, reverse=True)


def _row_tile_candidates(rows: int, row_tile_max: int, sub: int):
    if rows <= row_tile_max:
        first = rows  # full-extent block is always layout-legal
    else:
        first = max(sub, (row_tile_max // sub) * sub)
    cands = [first]
    v = first
    while v > sub:
        v = max(sub, ((v // 2) // sub) * sub)
        if v != cands[-1]:
            cands.append(v)
    return cands


def _working_set_bytes(row_tile, h_tile, emb, x_item, w_item):
    """Double-buffered tile footprint + acc scratch + f32 hidden intermediates."""
    x_buf = 2 * row_tile * emb * x_item
    o_buf = 2 * row_tile * emb * x_item
    acc = row_tile * emb * 4
    w1 = 2 * emb * h_tile * w_item
    w2 = 2 * h_tile * emb * w_item
    bias = 2 * (h_tile + emb) * 4
    hid = 2 * row_tile * h_tile * 4  # f32 hidden activation + GELU temporaries
    return x_buf + o_buf + acc + w1 + w2 + bias + hid


def _choose_tiles(rows, emb, hidden, x_item, w_item, sub, budget, row_tile_max):
    h_cands = _h_tile_candidates(hidden)
    row_cands = _row_tile_candidates(rows, row_tile_max, sub)
    # Prefer the largest row tile (weights are re-streamed once per row block),
    # and for that row tile the largest hidden tile that fits the VMEM budget
    # (i.e. shrink h_tile before row_tile).
    for rt in row_cands:
        for ht in h_cands:
            if _working_set_bytes(rt, ht, emb, x_item, w_item) <= budget:
                return rt, ht
    return row_cands[-1], h_cands[-1]


def feed_forward(
    x,
    w1,
    b1,
    w2,
    b2,
    *,
    row_tile_max: int = 512,
    weights_dtype=None,
):
    """x: [..., emb]; w1: [emb, 4*emb]; b1: [4*emb]; w2: [4*emb, emb]; b2: [emb].

    Weights are stored [in, out] (already transposed vs. torch.nn.Linear.weight).
    """
    orig_shape = x.shape
    emb = orig_shape[-1]
    hidden = w1.shape[-1]
    assert w1.shape == (emb, hidden)
    assert w2.shape == (hidden, emb)
    assert b1.shape == (hidden,) and b2.shape == (emb,)

    if weights_dtype is not None:
        # Halves weight DMA bytes & VMEM footprint; accumulation stays f32.
        w1 = w1.astype(weights_dtype)
        w2 = w2.astype(weights_dtype)

    x2d = x.reshape(-1, emb)
    rows = x2d.shape[0]

    x_item = jnp.dtype(x.dtype).itemsize
    w_item = jnp.dtype(w1.dtype).itemsize
    sub = _sublane_multiple(x.dtype)

    # Per-generation VMEM budgeting: ~80% of physical VMEM as the Mosaic limit,
    # tiles sized to stay ~12 MiB below that (compiler intermediates headroom).
    vmem_cap = _vmem_capacity_bytes()
    vmem_limit = max(min(int(vmem_cap * 0.8), vmem_cap - (8 << 20)), 32 << 20)
    tile_budget = max(vmem_limit - (12 << 20), vmem_limit // 2)

    row_tile, h_tile = _choose_tiles(
        rows, emb, hidden, x_item, w_item, sub, tile_budget, row_tile_max
    )

    # When weights are fully resident (single hidden block), make sure the
    # "parallel" row axis has >= 2 blocks so a 2-TensorCore chip (v7x) can
    # shard it; the extra grid step is free since weights are not re-streamed.
    if hidden // h_tile == 1 and rows >= 2 * sub and pl.cdiv(rows, row_tile) < 2:
        row_tile = ((-(-rows // 2) + sub - 1) // sub) * sub

    num_row_blocks = pl.cdiv(rows, row_tile)
    num_h_blocks = hidden // h_tile
    grid = (num_row_blocks, num_h_blocks)

    b1_2d = b1.reshape(1, hidden)
    b2_2d = b2.reshape(1, emb)

    # W1/W2 are re-DMAed once per row block unless the hidden axis is a single
    # (VMEM-resident) block.
    weight_passes = 1 if num_h_blocks == 1 else num_row_blocks
    cost = pl.CostEstimate(
        flops=4 * rows * emb * hidden,           # two matmuls: 2*M*K*N each
        transcendentals=rows * hidden,           # tanh
        bytes_accessed=(
            2 * rows * emb * x_item
            + weight_passes * 2 * emb * hidden * w_item
            + (hidden + emb) * jnp.dtype(b1.dtype).itemsize
        ),
    )

    out2d = pl.pallas_call(
        feed_forward_kernel,
        out_shape=jax.ShapeDtypeStruct((rows, emb), x.dtype),
        grid_spec=pltpu.PrefetchScalarGridSpec(
            num_scalar_prefetch=0,
            grid=grid,
            in_specs=[
                pl.BlockSpec((row_tile, emb), lambda i, j: (i, 0)),   # x
                pl.BlockSpec((emb, h_tile), lambda i, j: (0, j)),     # W1
                pl.BlockSpec((1, h_tile), lambda i, j: (0, j)),       # b1
                pl.BlockSpec((h_tile, emb), lambda i, j: (j, 0)),     # W2
                pl.BlockSpec((1, emb), lambda i, j: (0, 0)),          # b2
            ],
            out_specs=pl.BlockSpec((row_tile, emb), lambda i, j: (i, 0)),
            scratch_shapes=[pltpu.VMEM((row_tile, emb), jnp.float32)],
        ),
        compiler_params=pltpu.CompilerParams(
            dimension_semantics=("parallel", "arbitrary"),
            vmem_limit_bytes=vmem_limit,
        ),
        cost_estimate=cost,
    )(x2d, w1, b1_2d, w2, b2_2d)

    return out2d.reshape(orig_shape)


def _reference_feed_forward(x, w1, b1, w2, b2):
    emb = x.shape[-1]
    x2d = x.reshape(-1, emb).astype(jnp.float32)
    h = jnp.dot(x2d, w1.astype(jnp.float32), preferred_element_type=jnp.float32,
                precision=jax.lax.Precision.HIGHEST) + b1
    h = 0.5 * h * (1.0 + jnp.tanh(_SQRT_2_OVER_PI * (h + 0.044715 * h ** 3)))
    o = jnp.dot(h, w2.astype(jnp.float32), preferred_element_type=jnp.float32,
                precision=jax.lax.Precision.HIGHEST) + b2
    return o.astype(x.dtype).reshape(x.shape)


if __name__ == "__main__":
    key = jax.random.PRNGKey(0)
    batch, seq, emb_dim = 2, 8, 128          # small but lane-dense (emb multiple of 128)
    hidden_dim = 4 * emb_dim                 # 512

    kx, k1, k2, k3, k4 = jax.random.split(key, 5)
    x = jax.random.normal(kx, (batch, seq, emb_dim), dtype=jnp.float32)
    # Weights stored already transposed relative to torch.nn.Linear (i.e. [in, out]).
    w1 = jax.random.normal(k1, (emb_dim, hidden_dim), dtype=jnp.float32) / math.sqrt(emb_dim)
    b1 = jax.random.normal(k2, (hidden_dim,), dtype=jnp.float32) * 0.01
    w2 = jax.random.normal(k3, (hidden_dim, emb_dim), dtype=jnp.float32) / math.sqrt(hidden_dim)
    b2 = jax.random.normal(k4, (emb_dim,), dtype=jnp.float32) * 0.01

    out = jax.block_until_ready(feed_forward(x, w1, b1, w2, b2))
    ref = _reference_feed_forward(x, w1, b1, w2, b2)

    assert out.shape == x.shape
    assert out.dtype == x.dtype
    # Default MXU precision (single-pass, f32 accumulation) vs. the all-f32
    # HIGHEST-precision reference -> relaxed tolerance.
    max_err = float(jnp.max(jnp.abs(out.astype(jnp.float32) - ref.astype(jnp.float32))))
    assert max_err < 5e-2, max_err

    print("KERNEL_OK")
</pallas_src>

<mosaic_0001>
module attributes {stable_mosaic.version = 11 : i64} {
  func.func @feed_forward_kernel(%arg0: i32, %arg1: i32, %arg2: memref<8x128xf32, #tpu.memory_space<vmem>>, %arg3: memref<128x512xf32, #tpu.memory_space<vmem>>, %arg4: memref<1x512xf32, #tpu.memory_space<vmem>>, %arg5: memref<512x128xf32, #tpu.memory_space<vmem>>, %arg6: memref<1x128xf32, #tpu.memory_space<vmem>>, %arg7: memref<8x128xf32, #tpu.memory_space<vmem>>, %arg8: memref<8x128xf32, #tpu.memory_space<vmem>>) attributes {dimension_semantics = [#tpu.dimension_semantics<parallel>, #tpu.dimension_semantics<arbitrary>], iteration_bounds = array<i64: 2, 1>, scalar_prefetch = 0 : i64, scratch_operands = 1 : i64, tpu.core_type = #tpu.core_type<tc>, window_params = [{transform_indices = @transform_0, window_bounds = array<i64: 8, 128>}, {transform_indices = @transform_1, window_bounds = array<i64: 128, 512>}, {transform_indices = @transform_2, window_bounds = array<i64: 1, 512>}, {transform_indices = @transform_3, window_bounds = array<i64: 512, 128>}, {pipeline_mode = #tpu.pipeline_mode<synchronous>, transform_indices = @transform_4, window_bounds = array<i64: 1, 128>}, {transform_indices = @transform_5, window_bounds = array<i64: 8, 128>}]} {
    %c0_i32 = arith.constant 0 : i32
    %0 = arith.cmpi eq, %arg1, %c0_i32 : i32
    %1 = arith.extui %0 : i1 to i32
    %c0_i32_0 = arith.constant 0 : i32
    %2 = arith.cmpi ne, %1, %c0_i32_0 : i32
    scf.if %2 {
      %cst_19 = arith.constant 0.000000e+00 : f32
      %30 = vector.broadcast %cst_19 : f32 to vector<8x128xf32>
      %c0_20 = arith.constant 0 : index
      %c0_21 = arith.constant 0 : index
      %31 = vector.load %arg8[%c0_20, %c0_21] : memref<8x128xf32, #tpu.memory_space<vmem>>, vector<8x128xf32>
      tpu.vector_store %arg8[%c0_20, %c0_21], %30 {strides = array<i32>} : memref<8x128xf32, #tpu.memory_space<vmem>>, vector<8x128xf32>,
    } else {
    }
    %c0 = arith.constant 0 : index
    %c0_1 = arith.constant 0 : index
    %3 = vector.load %arg2[%c0, %c0_1] : memref<8x128xf32, #tpu.memory_space<vmem>>, vector<8x128xf32>
    %c0_2 = arith.constant 0 : index
    %c0_3 = arith.constant 0 : index
    %4 = vector.load %arg3[%c0_2, %c0_3] : memref<128x512xf32, #tpu.memory_space<vmem>>, vector<128x512xf32>
    %cst = arith.constant dense<0.000000e+00> : vector<8x512xf32>
    %5 = tpu.matmul %3, %4, %cst {dimension_numbers = #tpu.dot_dimension_numbers<[1], [0], [0], [1], [0, 0, 1, 1], [], []>} : vector<8x128xf32>, vector<128x512xf32>, vector<8x512xf32> -> vector<8x512xf32>
    %c0_4 = arith.constant 0 : index
    %c0_5 = arith.constant 0 : index
    %6 = vector.load %arg4[%c0_4, %c0_5] : memref<1x512xf32, #tpu.memory_space<vmem>>, vector<1x512xf32>
    %7 = vector.broadcast %6 : vector<1x512xf32> to vector<8x512xf32>
    %8 = arith.addf %5, %7 : vector<8x512xf32>
    %cst_6 = arith.constant 5.000000e-01 : f32
    %9 = vector.broadcast %cst_6 : f32 to vector<8x512xf32>
    %10 = arith.mulf %9, %8 : vector<8x512xf32>
    %11 = arith.mulf %8, %8 : vector<8x512xf32>
    %12 = arith.mulf %11, %8 : vector<8x512xf32>
    %cst_7 = arith.constant 4.471500e-02 : f32
    %13 = vector.broadcast %cst_7 : f32 to vector<8x512xf32>
    %14 = arith.mulf %13, %12 : vector<8x512xf32>
    %15 = arith.addf %8, %14 : vector<8x512xf32>
    %cst_8 = arith.constant 0.797884583 : f32
    %16 = vector.broadcast %cst_8 : f32 to vector<8x512xf32>
    %17 = arith.mulf %16, %15 : vector<8x512xf32>
    %18 = math.tanh %17 : vector<8x512xf32>
    %cst_9 = arith.constant 1.000000e+00 : f32
    %19 = vector.broadcast %cst_9 : f32 to vector<8x512xf32>
    %20 = arith.addf %19, %18 : vector<8x512xf32>
    %21 = arith.mulf %10, %20 : vector<8x512xf32>
    %c0_10 = arith.constant 0 : index
    %c0_11 = arith.constant 0 : index
    %22 = vector.load %arg8[%c0_10, %c0_11] : memref<8x128xf32, #tpu.memory_space<vmem>>, vector<8x128xf32>
    %c0_12 = arith.constant 0 : index
    %c0_13 = arith.constant 0 : index
    %23 = vector.load %arg5[%c0_12, %c0_13] : memref<512x128xf32, #tpu.memory_space<vmem>>, vector<512x128xf32>
    %cst_14 = arith.constant dense<0.000000e+00> : vector<8x128xf32>
    %24 = tpu.matmul %21, %23, %cst_14 {dimension_numbers = #tpu.dot_dimension_numbers<[1], [0], [0], [1], [0, 0, 1, 1], [], []>} : vector<8x512xf32>, vector<512x128xf32>, vector<8x128xf32> -> vector<8x128xf32>
    %25 = arith.addf %22, %24 : vector<8x128xf32>
    %c0_15 = arith.constant 0 : index
    %c0_16 = arith.constant 0 : index
    %26 = vector.load %arg8[%c0_15, %c0_16] : memref<8x128xf32, #tpu.memory_space<vmem>>, vector<8x128xf32>
    tpu.vector_store %arg8[%c0_15, %c0_16], %25 {strides = array<i32>} : memref<8x128xf32, #tpu.memory_space<vmem>>, vector<8x128xf32>,
    %c0_i32_17 = arith.constant 0 : i32
    %27 = arith.cmpi eq, %arg1, %c0_i32_17 : i32
    %28 = arith.extui %27 : i1 to i32
    %c0_i32_18 = arith.constant 0 : i32
    %29 = arith.cmpi ne, %28, %c0_i32_18 : i32
    scf.if %29 {
      %c0_19 = arith.constant 0 : index
      %c0_20 = arith.constant 0 : index
      %30 = vector.load %arg8[%c0_19, %c0_20] : memref<8x128xf32, #tpu.memory_space<vmem>>, vector<8x128xf32>
      %c0_21 = arith.constant 0 : index
      %c0_22 = arith.constant 0 : index
      %31 = vector.load %arg6[%c0_21, %c0_22] : memref<1x128xf32, #tpu.memory_space<vmem>>, vector<1x128xf32>
      %32 = vector.broadcast %31 : vector<1x128xf32> to vector<8x128xf32>
      %33 = arith.addf %30, %32 : vector<8x128xf32>
      %c0_23 = arith.constant 0 : index
      %c0_24 = arith.constant 0 : index
      %34 = vector.load %arg7[%c0_23, %c0_24] : memref<8x128xf32, #tpu.memory_space<vmem>>, vector<8x128xf32>
      tpu.vector_store %arg7[%c0_23, %c0_24], %33 {strides = array<i32>} : memref<8x128xf32, #tpu.memory_space<vmem>>, vector<8x128xf32>,
    } else {
    }
    return
  }
  func.func @transform_0(%arg0: i32, %arg1: i32) -> (i32, i32) {
    %c0_i32 = arith.constant 0 : i32
    %c0_i32_0 = arith.constant 0 : i32
    return %arg0, %c0_i32 : i32, i32
  }
  func.func @transform_1(%arg0: i32, %arg1: i32) -> (i32, i32) {
    %c0_i32 = arith.constant 0 : i32
    %c0_i32_0 = arith.constant 0 : i32
    return %c0_i32, %arg1 : i32, i32
  }
  func.func @transform_2(%arg0: i32, %arg1: i32) -> (i32, i32) {
    %c0_i32 = arith.constant 0 : i32
    %c0_i32_0 = arith.constant 0 : i32
    return %c0_i32, %arg1 : i32, i32
  }
  func.func @transform_3(%arg0: i32, %arg1: i32) -> (i32, i32) {
    %c0_i32 = arith.constant 0 : i32
    %c0_i32_0 = arith.constant 0 : i32
    return %arg1, %c0_i32 : i32, i32
  }
  func.func @transform_4(%arg0: i32, %arg1: i32) -> (i32, i32) {
    %c0_i32 = arith.constant 0 : i32
    %c0_i32_0 = arith.constant 0 : i32
    %c0_i32_1 = arith.constant 0 : i32
    return %c0_i32, %c0_i32_0 : i32, i32
  }
  func.func @transform_5(%arg0: i32, %arg1: i32) -> (i32, i32) {
    %c0_i32 = arith.constant 0 : i32
    %c0_i32_0 = arith.constant 0 : i32
    return %arg0, %c0_i32 : i32, i32
  }
}

</mosaic_0001>

<bundles_post_ra>
// kernel: tpu_custom_call.1
= control target key start
LH: loop header
LB: loop body
LE: loop exit
PB: predicated region body
PF: predicated region fallthrough
CT: control target
= control target key end

     0   :  { %s1566_s0 = inlined_call_operand.hbm [shape: f32[16,128], index: 0, kind: input, shape index: {}]   ;;  %s1567_s1 = inlined_call_operand.hbm [shape: f32[128,512], index: 1, kind: input, shape index: {}]   ;;  %s1568_s2 = inlined_call_operand.hbm [shape: f32[1,512], index: 2, kind: input, shape index: {}]   ;;  %s1569_s3 = inlined_call_operand.hbm [shape: f32[512,128], index: 3, kind: input, shape index: {}]   ;;  %s1570_s4 = inlined_call_operand.vmem [shape: f32[1,128], index: 4, kind: input, shape index: {}]   ;;  %s1571_s5 = inlined_call_operand.hbm [shape: f32[16,128], index: 5, kind: output, shape index: {}]  }
   0x1   :  { %1576 = sst [smem:[#allocation16_spill]] %s1567_s1 }
   0x2   :  { %10 = vsyncpa [#allocation4], 0 }
   0x3   :  { %12 = vsyncpa [#allocation4 + $0x1], 0 }
   0x4   :  { %13 = vsyncpa [#allocation7], 0 }
   0x5   :  { %14 = vsyncpa [#allocation10], 0 }
   0x6   :  { %15 = vsyncpa [#allocation5], 0 }
   0x7   :  { %17 = vsyncpa [#allocation5 + $0x1], 0  ;;  %s1370_s18 = smov 0   ;;  %s1372_s19 = smov 0  }
   0x8   :  { %s1374_s20 = smov 0   ;;  %s1376_s21 = smov 0  }
   0x9   :  { %s1378_s22 = smov 0   ;;  %s1380_s23 = smov 0  }
   0xa LB: > { %s938_s24 = sadd.s32 4294967295, %s1328_s23   ;;  %s939_s25 = sadd.s32 4294967294, %s1328_s23   ;;  %s1328_s23 = sphi %s1380_s23, %s23_s23   ;;  %s1324_s22 = sphi %s1378_s22, %s1595_s22   ;;  %s1320_s21 = sphi %s1376_s21, %s1594_s21   ;;  %s1316_s20 = sphi %s1374_s20, %s1593_s20   ;;  %s1312_s19 = sphi %s1372_s19, %s1592_s19   ;;  %s1308_s18 = sphi %s1370_s18, %s1591_s18  }
   0xb   : > { %p55_p0 = scmp.ne.s32.totalorder %s1312_s19, %s1308_s18  ;;  %p1404_p1 = scmp.eq.s32.totalorder %s938_s24, 0 }
   0xc   : > { %p1408_p2 = scmp.eq.s32.totalorder %s938_s24, 1  ;;  %p184_p3 = scmp.eq.s32.totalorder %s939_s25, 1 }
   0xd   : > { %s1577_s26 = scalar_select %p1404_p1, 1, 0 }
   0xe   : > { %p1414_p4 = por %p1404_p1, %p55_p0  ;;  %p940_p5 = scmp.ge.s32.totalorder %s1328_s23, 1 }
   0xf   : > { %p1419_p6 = por %p184_p3, %p55_p0  ;;  %p191_p7 = scmp.lt.s32.totalorder %s1328_s23, 3 }
  0x10   : > { %s1579_s28 = scalar_select %p1414_p4, 1, 0 }
  0x11   : > { %s1580_s29 = scalar_select %p1419_p6, 1, 0 }
  0x12   : > { %p1424_p8 = pnand %p940_p5, %p191_p7  ;;  %s1330_s6 = smov [#allocation6]  }
  0x13   : > { %s206_s7 = sshll.u32 %s1330_s6, 4  ;;  %s1331_s9 = smov [#allocation8]   ;;  %s207_s7 = int_to_ptr.vmem [resolvable:$true] %s206_s7 }
  0x14   : > { %s1581_s30 = scalar_select %p1424_p8, 1, 0 }
  0x15   : > { %p1044_p9 = pneg %p1424_p8  ;;  %s223_s10 = sshll.u32 %s1331_s9, 4  ;;  %s224_s10 = int_to_ptr.vmem [resolvable:$true] %s223_s10 }
  0x16   : > { %s1332_s11 = smov [#allocation9]   ;;  %s1145_s13 = scalar_lea.vmem %s207_s7, 8192 }
  0x17   : > { %p1433_p11 = pnand %p1044_p9, %p1404_p1  ;;  %s236_s12 = sshll.u32 %s1332_s11, 4  ;;  %s237_s12 = int_to_ptr.vmem [resolvable:$true] %s236_s12 }
  0x18   : > { %p1146_p13 = scmp.ne.s32.totalorder %s207_s7, %s1145_s13  ;;  %p1153_p5 = scmp.lt.s32.totalorder %s207_s7, %s207_s7 }
  0x19   : > { %p1136_p12 = pneg %p1433_p11  ;;  %p1154_p7 = scmp.lt.s32.totalorder %s1145_s13, %s1145_s13 }
  0x1b   : > { %p1148_p0 = pnand %p1146_p13, %p1136_p12  ;;  %p1155_p9 = por %p1154_p7, %p1153_p5 }
  0x1d   : > { %p1149_p3 = pneg %p1148_p0 }
  0x1f   : > { %p1156_p10 = pnand %p1155_p9, %p1149_p3 }
  0x21   : > { %1159 = shalt.err (!%p1156_p10)
}
  0x22   : > { %s1333_s14 = smov 512   ;;  %s1334_s15 = smov 32  }
  0x23   : > { %s1583_s1 = sld [smem:[#allocation16_spill]]  ;;  %s1171_s24 = scalar_lea.vmem %s224_s10, 64 }
  0x24   : > { %p1172_p6 = scmp.ne.s32.totalorder %s224_s10, %s1171_s24  ;;  %p1179_p1 = scmp.lt.s32.totalorder %s224_s10, %s224_s10 }
  0x25   : > { %p1180_p4 = scmp.lt.s32.totalorder %s1171_s24, %s1171_s24 }
  0x26   : > { %p1174_p13 = pnand %p1172_p6, %p1136_p12 }
  0x27   : > { %p1181_p5 = por %p1180_p4, %p1179_p1 }
  0x28   : > { %p1175_p0 = pneg %p1174_p13 }
  0x29   : > { %1047 = dma.hbm_to_vmem [thread:$0]  (!%p1433_p11), %s1583_s1, 8192, %s207_s7, [#allocation7], %s1333_s14, %s1333_s14, %s1334_s15  }
  0x2a   : > { %p1182_p3 = pnand %p1181_p5, %p1175_p0 }
  0x2c   : > { %1185 = shalt.err (!%p1182_p3)
}
  0x2d   : > { %1050 = dma.hbm_to_vmem [thread:$0]  (!%p1433_p11), %s1568_s2, 64, %s224_s10, [#allocation7]  }
  0x2e   : > { %s1197_s7 = scalar_lea.vmem %s237_s12, 8192  ;;  %p1205_p9 = scmp.lt.s32.totalorder %s237_s12, %s237_s12 }
  0x2f   : > { %p1198_p10 = scmp.ne.s32.totalorder %s237_s12, %s1197_s7  ;;  %p1206_p13 = scmp.lt.s32.totalorder %s1197_s7, %s1197_s7 }
  0x31   : > { %p1200_p7 = pnand %p1198_p10, %p1136_p12  ;;  %p1207_p8 = por %p1206_p13, %p1205_p9 }
  0x33   : > { %p1201_p6 = pneg %p1200_p7 }
  0x35   : > { %p1208_p1 = pnand %p1207_p8, %p1201_p6 }
  0x37   : > { %1211 = shalt.err (!%p1208_p1)
}
  0x38   : > { %s1335_s9 = smov 128   ;;  %s1336_s10 = smov 8  }
  0x39   : > { %1053 = dma.hbm_to_vmem [thread:$0]  (!%p1433_p11), %s1569_s3, 8192, %s237_s12, [#allocation10], %s1335_s9, %s1335_s9, %s1336_s10  }
  0x3a   : > { %s42_s14 = sadd.s32 1, %s1316_s20  ;;  %s35_s15 = sadd.s32 1, %s1324_s22 }
  0x3b   : > { %p49_p4 = scmp.ne.s32.totalorder %s1316_s20, %s1312_s19  ;;  %p37_p8 = scmp.ge.s32.totalorder %s35_s15, 2 }
  0x3c   : > { %p50_p12 = scmp.eq.s32.totalorder %s1328_s23, 0  ;;  %p1065_p5 = scmp.lt.s32.totalorder %s1328_s23, 2 }
  0x3d   : > { %p1470_p0 = por %p1408_p2, %p49_p4  ;;  %s1597_s15 = smov (%p37_p8, %s35_s15), 0 }
  0x3e   : > { %p51_p3 = por %p50_p12, %p49_p4  ;;  %s253_s8 = sand.u32 1, %s1316_s20  }
  0x3f   : > { %s39_s17 = ssub.s32 %s1324_s22, %s1597_s15  ;;  %s945_s12 = sshll.u32 %s253_s8, 3 }
  0x40   : > { %p40_p10 = scmp.eq.s32.totalorder %s39_s17, 0  ;;  %s946_s24 = sshll.u32 %s1324_s22, 7 }
  0x41   : > { %s262_s27 = scalar_lea.hbm %s1566_s0, %s946_s24  ;;  %s257_s9 = scalar_lea.vmem [#allocation3], %s945_s12 }
  0x42   : > { %s1482_s25 = scalar_select %p40_p10, %s1316_s20, %s42_s14  }
  0x43   : > { %s264_s10 = sshll.u32 %s257_s9, 4  ;;  %p1489_p2 = pnand %p1065_p5, %p51_p3  ;;  %s265_s10 = int_to_ptr.vmem [resolvable:$true] %s264_s10 }
  0x44   : > { %s254_s13 = scalar_lea.sflag [#allocation4], %s253_s8  ;;  %s1225_s17 = scalar_lea.vmem %s265_s10, 128 }
  0x45   : > { %p1214_p11 = pneg %p1489_p2  ;;  %p1226_p7 = scmp.ne.s32.totalorder %s265_s10, %s1225_s17 }
  0x46   : > { %s1337_s14 = smov [#allocation3]  }
  0x47   : > { %p1228_p6 = pnand %p1226_p7, %p1214_p11  ;;  %s1230_s1 = sshll.u32 %s1337_s14, 4  ;;  %s1231_s1 = int_to_ptr.vmem [resolvable:$false] %s1230_s1 }
  0x48   : > { %s1232_s24 = scalar_lea.vmem %s1231_s1, 256  ;;  %p1233_p13 = scmp.lt.s32.totalorder %s265_s10, %s1231_s1 }
  0x49   : > { %p1229_p9 = pneg %p1228_p6  ;;  %p1234_p1 = scmp.lt.s32.totalorder %s1232_s24, %s1225_s17 }
  0x4b   : > { %p1235_p4 = por %p1234_p1, %p1233_p13 }
  0x4d   : > { %p1236_p8 = pnand %p1235_p4, %p1229_p9 }
  0x4f   : > { %1239 = shalt.err (!%p1236_p8)
}
  0x50   : > { %1057 = dma.hbm_to_vmem [thread:$0]  (!%p1489_p2), %s262_s27, 128, %s265_s10, %s254_s13  }
  0x51   : > { %p1586_p12 = scmp.ne.s32.totalorder %s1581_s30, 0 }
  0x52   : > { %s1500_s8 = sand.u32 (!%p1586_p12), 1, %s1312_s19   ;;  %p1587_p5 = scmp.ne.s32.totalorder (!%p1586_p12), %s1579_s28, 0 }
  0x53   : > { %273 = sbr.rel (%p1586_p12) target bundleno = 569 (0x239), region = 40  ;;  %s948_s12 = sshll.u32 (!%p1586_p12), %s1500_s8, 3 }
  0x54   : > { %s276_s6 = scalar_lea.sflag (!%p1586_p12), [#allocation4], %s1500_s8  ;;  %s1506_s1 = scalar_lea.vmem (!%p1586_p12), [#allocation3], %s948_s12 }
  0x58   : > { %1291 = dma.done.wait (%p1587_p5), %s276_s6, 128  }
  0x59   : > { %1293 = vsyncadd (%p1587_p5), %s276_s6, 4294967168  ;;  %p1588_p3 = scmp.ne.s32.totalorder %s1577_s26, 0 }
  0x5b   : > { %1295 = dma.done.wait (%p1588_p3), [#allocation7], 8256  }
  0x5c   : > { %1297 = vsyncadd (%p1588_p3), [#allocation7], 4294959040 }
  0x5d   : > { %1299 = dma.done.wait (%p1588_p3), [#allocation10], 8192  }
  0x5e   : > { %1301 = vsyncadd (%p1588_p3), [#allocation10], 4294959104  ;;  %v1338_v0 = vmov 0.0   ;;  %v388_v1 = vld [vmem:[#allocation6 + $0x1e8] sm:$0xff]  ;;  %v390_v2 = vld [vmem:[#allocation6 + $0x1f8] sm:$0xff]  ;;  %s955_s30 = sshll.u32 %s1320_s21, 7 }
  0x5f   : > { %477 = vmatprep.mubr.f32.mxu0 %v1338_v0  ;;  %548 = vmatprep.mubr.f32.mxu1 %v1338_v0  ;;  %v387_v3 = vld [vmem:[#allocation6 + $0x1e0] sm:$0xff]  ;;  %v389_v4 = vld [vmem:[#allocation6 + $0x1f0] sm:$0xff]  ;;  %v384_v5 = vld [vmem:[#allocation6 + $0x1c8] sm:$0xff]  ;;  %s317_s7 = scalar_lea.vmem [#allocation11], %s948_s12  ;;  %s823_s11 = scalar_lea.hbm %s1571_s5, %s955_s30 }
  0x60   : > { %413 = vmatprep.subr.mxu0 %v388_v1  ;;  %484 = vmatprep.subr.mxu1 %v390_v2  ;;  %v386_v6 = vld [vmem:[#allocation6 + $0x1d8] sm:$0xff]  ;;  %v383_v7 = vld [vmem:[#allocation6 + $0x1c0] sm:$0xff]  ;;  %v385_v8 = vld [vmem:[#allocation6 + $0x1d0] sm:$0xff]  ;;  %s825_s27 = sshll.u32 %s317_s7, 4  ;;  %s812_s13 = scalar_lea.sflag [#allocation5], %s1500_s8  ;;  %s826_s27 = int_to_ptr.vmem [resolvable:$true] %s825_s27 }
  0x61   : > { %414 = vmatpush1.msra.mxu0 %v387_v3  ;;  %485 = vmatpush1.msra.mxu1 %v389_v4  ;;  %v380_v9 = vld [vmem:[#allocation6 + $0x1a8] sm:$0xff]  ;;  %v382_v10 = vld [vmem:[#allocation6 + $0x1b8] sm:$0xff]  ;;  %v379_v11 = vld [vmem:[#allocation6 + $0x1a0] sm:$0xff]  ;;  %s1240_s17 = scalar_lea.vmem %s826_s27, 128  ;;  %s1339_s14 = smov [#allocation11]  }
  0x62   : > { %415 = vmatprep.subr.mxu0 %v384_v5  ;;  %486 = vmatprep.subr.mxu1 %v386_v6  ;;  %v381_v12 = vld [vmem:[#allocation6 + $0x1b0] sm:$0xff]  ;;  %v376_v13 = vld [vmem:[#allocation6 + $0x188] sm:$0xff]  ;;  %v378_v14 = vld [vmem:[#allocation6 + $0x198] sm:$0xff]  ;;  %p1241_p10 = scmp.ne.s32.totalorder %s826_s27, %s1240_s17  ;;  %s1244_s24 = sshll.u32 %s1339_s14, 4  ;;  %s1245_s24 = int_to_ptr.vmem [resolvable:$false] %s1244_s24 }
  0x63   : > { %416 = vmatpush1.msra.mxu0 %v383_v7  ;;  %487 = vmatpush1.msra.mxu1 %v385_v8  ;;  %v375_v15 = vld [vmem:[#allocation6 + $0x180] sm:$0xff]  ;;  %v377_v16 = vld [vmem:[#allocation6 + $0x190] sm:$0xff]  ;;  %v372_v17 = vld [vmem:[#allocation6 + $0x168] sm:$0xff]  ;;  %s1246_s21 = scalar_lea.vmem %s1245_s24, 256  ;;  %p1247_p7 = scmp.lt.s32.totalorder %s826_s27, %s1245_s24 }
  0x64   : > { %417 = vmatprep.subr.mxu0 %v380_v9  ;;  %488 = vmatprep.subr.mxu1 %v382_v10  ;;  %v374_v18 = vld [vmem:[#allocation6 + $0x178] sm:$0xff]  ;;  %v371_v19 = vld [vmem:[#allocation6 + $0x160] sm:$0xff]  ;;  %v373_v20 = vld [vmem:[#allocation6 + $0x170] sm:$0xff]  ;;  %p1242_p2 = pnand %p1241_p10, %p1470_p0  ;;  %p1248_p6 = scmp.lt.s32.totalorder %s1246_s21, %s1240_s17 }
  0x65   : > { %418 = vmatpush1.msra.mxu0 %v379_v11  ;;  %489 = vmatpush1.msra.mxu1 %v381_v12  ;;  %v368_v21 = vld [vmem:[#allocation6 + $0x148] sm:$0xff]  ;;  %v370_v22 = vld [vmem:[#allocation6 + $0x158] sm:$0xff]  ;;  %v367_v23 = vld [vmem:[#allocation6 + $0x140] sm:$0xff] }
  0x66   : > { %419 = vmatprep.subr.mxu0 %v376_v13  ;;  %490 = vmatprep.subr.mxu1 %v378_v14  ;;  %v369_v24 = vld [vmem:[#allocation6 + $0x150] sm:$0xff]  ;;  %v364_v25 = vld [vmem:[#allocation6 + $0x128] sm:$0xff]  ;;  %v366_v26 = vld [vmem:[#allocation6 + $0x138] sm:$0xff]  ;;  %p1243_p11 = pneg %p1242_p2  ;;  %p1249_p9 = por %p1248_p6, %p1247_p7 }
  0x67   : > { %420 = vmatpush1.msra.mxu0 %v375_v15  ;;  %491 = vmatpush1.msra.mxu1 %v377_v16  ;;  %v363_v27 = vld [vmem:[#allocation6 + $0x120] sm:$0xff]  ;;  %v365_v28 = vld [vmem:[#allocation6 + $0x130] sm:$0xff]  ;;  %v360_v29 = vld [vmem:[#allocation6 + $0x108] sm:$0xff] }
  0x68   : > { %421 = vmatprep.subr.mxu0 %v372_v17  ;;  %492 = vmatprep.subr.mxu1 %v374_v18  ;;  %v362_v30 = vld [vmem:[#allocation6 + $0x118] sm:$0xff]  ;;  %v359_v31 = vld [vmem:[#allocation6 + $0x100] sm:$0xff]  ;;  %v361_v32 = vld [vmem:[#allocation6 + $0x110] sm:$0xff]  ;;  %p1250_p13 = pnand %p1249_p9, %p1243_p11 }
  0x69   : > { %422 = vmatpush1.msra.mxu0 %v371_v19  ;;  %493 = vmatpush1.msra.mxu1 %v373_v20  ;;  %v356_v33 = vld [vmem:[#allocation6 + $0xe8] sm:$0xff]  ;;  %v358_v34 = vld [vmem:[#allocation6 + $0xf8] sm:$0xff]  ;;  %v355_v35 = vld [vmem:[#allocation6 + $0xe0] sm:$0xff] }
  0x6a   : > { %423 = vmatprep.subr.mxu0 %v368_v21  ;;  %494 = vmatprep.subr.mxu1 %v370_v22  ;;  %v357_v36 = vld [vmem:[#allocation6 + $0xf0] sm:$0xff]  ;;  %v352_v37 = vld [vmem:[#allocation6 + $0xc8] sm:$0xff]  ;;  %v354_v38 = vld [vmem:[#allocation6 + $0xd8] sm:$0xff] }
  0x6b   : > { %424 = vmatpush1.msra.mxu0 %v367_v23  ;;  %495 = vmatpush1.msra.mxu1 %v369_v24  ;;  %v351_v39 = vld [vmem:[#allocation6 + $0xc0] sm:$0xff]  ;;  %v353_v40 = vld [vmem:[#allocation6 + $0xd0] sm:$0xff]  ;;  %v348_v41 = vld [vmem:[#allocation6 + $0xa8] sm:$0xff] }
  0x6c   : > { %425 = vmatprep.subr.mxu0 %v364_v25  ;;  %496 = vmatprep.subr.mxu1 %v366_v26  ;;  %v350_v42 = vld [vmem:[#allocation6 + $0xb8] sm:$0xff]  ;;  %v347_v43 = vld [vmem:[#allocation6 + $0xa0] sm:$0xff]  ;;  %v349_v44 = vld [vmem:[#allocation6 + $0xb0] sm:$0xff] }
  0x6d   : > { %426 = vmatpush1.msra.mxu0 %v363_v27  ;;  %497 = vmatpush1.msra.mxu1 %v365_v28  ;;  %v344_v45 = vld [vmem:[#allocation6 + $0x88] sm:$0xff]  ;;  %v346_v46 = vld [vmem:[#allocation6 + $0x98] sm:$0xff]  ;;  %v343_v47 = vld [vmem:[#allocation6 + $0x80] sm:$0xff] }
  0x6e   : > { %427 = vmatprep.subr.mxu0 %v360_v29  ;;  %498 = vmatprep.subr.mxu1 %v362_v30  ;;  %v345_v48 = vld [vmem:[#allocation6 + $0x90] sm:$0xff]  ;;  %v340_v49 = vld [vmem:[#allocation6 + $0x68] sm:$0xff]  ;;  %v342_v50 = vld [vmem:[#allocation6 + $0x78] sm:$0xff] }
  0x6f   : > { %428 = vmatpush1.msra.mxu0 %v359_v31  ;;  %499 = vmatpush1.msra.mxu1 %v361_v32  ;;  %v339_v51 = vld [vmem:[#allocation6 + $0x60] sm:$0xff]  ;;  %v341_v52 = vld [vmem:[#allocation6 + $0x70] sm:$0xff]  ;;  %v336_v53 = vld [vmem:[#allocation6 + $0x48] sm:$0xff] }
  0x70   : > { %429 = vmatprep.subr.mxu0 %v356_v33  ;;  %500 = vmatprep.subr.mxu1 %v358_v34  ;;  %v338_v54 = vld [vmem:[#allocation6 + $0x58] sm:$0xff]  ;;  %v335_v55 = vld [vmem:[#allocation6 + $0x40] sm:$0xff]  ;;  %v337_v56 = vld [vmem:[#allocation6 + $0x50] sm:$0xff] }
  0x71   : > { %430 = vmatpush1.msra.mxu0 %v355_v35  ;;  %501 = vmatpush1.msra.mxu1 %v357_v36  ;;  %v332_v57 = vld [vmem:[#allocation6 + $0x28] sm:$0xff]  ;;  %v334_v58 = vld [vmem:[#allocation6 + $0x38] sm:$0xff]  ;;  %v331_v59 = vld [vmem:[#allocation6 + $0x20] sm:$0xff] }
  0x72   : > { %431 = vmatprep.subr.mxu0 %v352_v37  ;;  %502 = vmatprep.subr.mxu1 %v354_v38  ;;  %v333_v60 = vld [vmem:[#allocation6 + $0x30] sm:$0xff]  ;;  %v328_v61 = vld [vmem:[#allocation6 + $0x8] sm:$0xff]  ;;  %v330_v62 = vld [vmem:[#allocation6 + $0x18] sm:$0xff] }
  0x73   : > { %432 = vmatpush1.msra.mxu0 %v351_v39  ;;  %503 = vmatpush1.msra.mxu1 %v353_v40  ;;  %v327_v63 = vld [vmem:[#allocation6] sm:$0xff]  ;;  %v329_v0 = vld [vmem:[#allocation6 + $0x10] sm:$0xff] }
  0x74   : > { %433 = vmatprep.subr.mxu0 %v348_v41  ;;  %504 = vmatprep.subr.mxu1 %v350_v42  ;;  %v326_v1 = vld [vmem:[%s1506_s1] sm:$0xff]  ;;  %v620_v14 = vld [vmem:[#allocation9 + $0xe0] sm:$0xff] }
  0x75   : > { %434 = vmatpush1.msra.mxu0 %v347_v43  ;;  %505 = vmatpush1.msra.mxu1 %v349_v44  ;;  %v623_v2 = vld [vmem:[#allocation9 + $0xf8] sm:$0xff]  ;;  %v622_v6 = vld [vmem:[#allocation9 + $0xf0] sm:$0xff]  ;;  %v621_v10 = vld [vmem:[#allocation9 + $0xe8] sm:$0xff] }
  0x76   : > { %435 = vmatprep.subr.mxu0 %v344_v45  ;;  %506 = vmatprep.subr.mxu1 %v346_v46  ;;  %v655_v3 = vld [vmem:[#allocation9 + $0x1f8] sm:$0xff]  ;;  %v654_v7 = vld [vmem:[#allocation9 + $0x1f0] sm:$0xff]  ;;  %v653_v11 = vld [vmem:[#allocation9 + $0x1e8] sm:$0xff] }
  0x77   : > { %436 = vmatpush1.msra.mxu0 %v343_v47  ;;  %507 = vmatpush1.msra.mxu1 %v345_v48  ;;  %v607_v4 = vld [vmem:[#allocation9 + $0x78] sm:$0xff]  ;;  %v606_v8 = vld [vmem:[#allocation9 + $0x70] sm:$0xff]  ;;  %v605_v12 = vld [vmem:[#allocation9 + $0x68] sm:$0xff] }
  0x78   : > { %437 = vmatprep.subr.mxu0 %v340_v49  ;;  %508 = vmatprep.subr.mxu1 %v342_v50  ;;  %v639_v5 = vld [vmem:[#allocation9 + $0x178] sm:$0xff]  ;;  %v638_v9 = vld [vmem:[#allocation9 + $0x170] sm:$0xff]  ;;  %v637_v13 = vld [vmem:[#allocation9 + $0x168] sm:$0xff] }
  0x79   : > { %438 = vmatpush1.msra.mxu0 %v339_v51  ;;  %509 = vmatpush1.msra.mxu1 %v341_v52  ;;  %v652_v15 = vld [vmem:[#allocation9 + $0x1e0] sm:$0xff]  ;;  %v619_v18 = vld [vmem:[#allocation9 + $0xd8] sm:$0xff]  ;;  %v618_v22 = vld [vmem:[#allocation9 + $0xd0] sm:$0xff] }
  0x7a   : > { %439 = vmatprep.subr.mxu0 %v336_v53  ;;  %510 = vmatprep.subr.mxu1 %v338_v54  ;;  %v604_v16 = vld [vmem:[#allocation9 + $0x60] sm:$0xff]  ;;  %v651_v19 = vld [vmem:[#allocation9 + $0x1d8] sm:$0xff]  ;;  %v650_v23 = vld [vmem:[#allocation9 + $0x1d0] sm:$0xff] }
  0x7b   : > { %440 = vmatpush1.msra.mxu0 %v335_v55  ;;  %511 = vmatpush1.msra.mxu1 %v337_v56  ;;  %v636_v17 = vld [vmem:[#allocation9 + $0x160] sm:$0xff]  ;;  %v603_v20 = vld [vmem:[#allocation9 + $0x58] sm:$0xff]  ;;  %v602_v24 = vld [vmem:[#allocation9 + $0x50] sm:$0xff] }
  0x7c   : > { %441 = vmatprep.subr.mxu0 %v332_v57  ;;  %512 = vmatprep.subr.mxu1 %v334_v58  ;;  %v635_v21 = vld [vmem:[#allocation9 + $0x158] sm:$0xff]  ;;  %v634_v25 = vld [vmem:[#allocation9 + $0x150] sm:$0xff]  ;;  %v617_v26 = vld [vmem:[#allocation9 + $0xc8] sm:$0xff] }
  0x7d   : > { %442 = vmatpush1.msra.mxu0 %v331_v59  ;;  %513 = vmatpush1.msra.mxu1 %v333_v60  ;;  %v649_v27 = vld [vmem:[#allocation9 + $0x1c8] sm:$0xff]  ;;  %v616_v30 = vld [vmem:[#allocation9 + $0xc0] sm:$0xff]  ;;  %v615_v34 = vld [vmem:[#allocation9 + $0xb8] sm:$0xff] }
  0x7e   : > { %443 = vmatprep.subr.mxu0 %v328_v61  ;;  %514 = vmatprep.subr.mxu1 %v330_v62  ;;  %v601_v28 = vld [vmem:[#allocation9 + $0x48] sm:$0xff]  ;;  %v648_v31 = vld [vmem:[#allocation9 + $0x1c0] sm:$0xff]  ;;  %v647_v35 = vld [vmem:[#allocation9 + $0x1b8] sm:$0xff] }
  0x7f   : > { %444 = vmatpush1.msra.mxu0 %v327_v63  ;;  %515 = vmatpush1.msra.mxu1 %v329_v0  ;;  %v633_v29 = vld [vmem:[#allocation9 + $0x148] sm:$0xff]  ;;  %v600_v32 = vld [vmem:[#allocation9 + $0x40] sm:$0xff]  ;;  %v599_v36 = vld [vmem:[#allocation9 + $0x38] sm:$0xff] }
  0x80   : > { %478 = vmatmul.mubr.f32.vlgmr.msra.gmra.mxu0 %v326_v1  ;;  %549 = vmatmul.mubr.f32.vlgmr.msra.gmra.mxu1 %v326_v1  ;;  %v632_v33 = vld [vmem:[#allocation9 + $0x140] sm:$0xff]  ;;  %v631_v37 = vld [vmem:[#allocation9 + $0x138] sm:$0xff]  ;;  %v614_v38 = vld [vmem:[#allocation9 + $0xb0] sm:$0xff] }
  0x81   : > { %958 = vmatprep.subr.mxu0 %v623_v2  ;;  %993 = vmatprep.subr.mxu1 %v655_v3  ;;  %v646_v39 = vld [vmem:[#allocation9 + $0x1b0] sm:$0xff]  ;;  %v613_v42 = vld [vmem:[#allocation9 + $0xa8] sm:$0xff]  ;;  %v612_v46 = vld [vmem:[#allocation9 + $0xa0] sm:$0xff]  ;;  %v393_v2 = vlaneseq }
  0x82   : > { %959 = vmatpush3.msra.mxu0 %v607_v4  ;;  %994 = vmatpush3.msra.mxu1 %v639_v5  ;;  %v598_v40 = vld [vmem:[#allocation9 + $0x30] sm:$0xff]  ;;  %v645_v43 = vld [vmem:[#allocation9 + $0x1a8] sm:$0xff]  ;;  %v644_v47 = vld [vmem:[#allocation9 + $0x1a0] sm:$0xff] }
  0x83   : > { %960 = vmatprep.subr.mxu0 %v622_v6  ;;  %995 = vmatprep.subr.mxu1 %v654_v7  ;;  %v630_v41 = vld [vmem:[#allocation9 + $0x130] sm:$0xff]  ;;  %v597_v44 = vld [vmem:[#allocation9 + $0x28] sm:$0xff]  ;;  %v596_v48 = vld [vmem:[#allocation9 + $0x20] sm:$0xff]  ;;  %v394_v3 = vshrl.u32 %v393_v2, 7 }
  0x84   : > { %961 = vmatpush3.msra.mxu0 %v606_v8  ;;  %996 = vmatpush3.msra.mxu1 %v638_v9  ;;  %v629_v45 = vld [vmem:[#allocation9 + $0x128] sm:$0xff]  ;;  %v628_v49 = vld [vmem:[#allocation9 + $0x120] sm:$0xff]  ;;  %v611_v50 = vld [vmem:[#allocation9 + $0x98] sm:$0xff] }
  0x85   : > { %962 = vmatprep.subr.mxu0 %v621_v10  ;;  %997 = vmatprep.subr.mxu1 %v653_v11  ;;  %v643_v51 = vld [vmem:[#allocation9 + $0x198] sm:$0xff]  ;;  %v610_v54 = vld [vmem:[#allocation9 + $0x90] sm:$0xff]  ;;  %v609_v58 = vld [vmem:[#allocation9 + $0x88] sm:$0xff]  ;;  %v395_v4 = vsub.s32 0, %v394_v3  ;;  %v403_v5 = vsub.s32 2, %v394_v3  ;;  %v399_v7 = vsub.s32 1, %v394_v3 }
  0x86   : > { %963 = vmatpush3.msra.mxu0 %v605_v12  ;;  %998 = vmatpush3.msra.mxu1 %v637_v13  ;;  %v595_v52 = vld [vmem:[#allocation9 + $0x18] sm:$0xff]  ;;  %v642_v55 = vld [vmem:[#allocation9 + $0x190] sm:$0xff]  ;;  %v641_v59 = vld [vmem:[#allocation9 + $0x188] sm:$0xff]  ;;  %v407_v8 = vsub.s32 3, %v394_v3 }
  0x87   : > { %964 = vmatprep.subr.mxu0 %v620_v14  ;;  %999 = vmatprep.subr.mxu1 %v652_v15  ;;  %v627_v53 = vld [vmem:[#allocation9 + $0x118] sm:$0xff]  ;;  %v594_v56 = vld [vmem:[#allocation9 + $0x10] sm:$0xff]  ;;  %v593_v60 = vld [vmem:[#allocation9 + $0x8] sm:$0xff] }
  0x88   : > { %965 = vmatpush3.msra.mxu0 %v604_v16  ;;  %1000 = vmatpush3.msra.mxu1 %v636_v17  ;;  %v626_v57 = vld [vmem:[#allocation9 + $0x110] sm:$0xff]  ;;  %v625_v61 = vld [vmem:[#allocation9 + $0x108] sm:$0xff]  ;;  %v608_v62 = vld [vmem:[#allocation9 + $0x80] sm:$0xff] }
  0x89   : > { %966 = vmatprep.subr.mxu0 %v619_v18  ;;  %1001 = vmatprep.subr.mxu1 %v651_v19  ;;  %v640_v63 = vld [vmem:[#allocation9 + $0x180] sm:$0xff]  ;;  %v391_v6 = vld [vmem:[#allocation8] sm:$0xf] }
  0x8a   : > { %967 = vmatpush3.msra.mxu0 %v603_v20  ;;  %1002 = vmatpush3.msra.mxu1 %v635_v21  ;;  %v592_v0 = vld [vmem:[#allocation9] sm:$0xff]  ;;  %v396_v9 = vrot.slane %v391_v6, %v395_v4  ;;  %v404_v10 = vrot.slane %v391_v6, %v403_v5  ;;  %v400_v13 = vrot.slane %v391_v6, %v399_v7 }
  0x8b   : > { %968 = vmatprep.subr.mxu0 %v618_v22  ;;  %1003 = vmatprep.subr.mxu1 %v650_v23  ;;  %v624_v1 = vld [vmem:[#allocation9 + $0x100] sm:$0xff]  ;;  %v408_v14 = vrot.slane %v391_v6, %v407_v8 }
  0x8c   : > { %969 = vmatpush3.msra.mxu0 %v602_v24  ;;  %1004 = vmatpush3.msra.mxu1 %v634_v25 }
  0x8d   : > { %970 = vmatprep.subr.mxu0 %v617_v26  ;;  %1005 = vmatprep.subr.mxu1 %v649_v27 }
  0x8e   : > { %971 = vmatpush3.msra.mxu0 %v601_v28  ;;  %1006 = vmatpush3.msra.mxu1 %v633_v29 }
  0x8f   : > { %972 = vmatprep.subr.mxu0 %v616_v30  ;;  %1007 = vmatprep.subr.mxu1 %v648_v31 }
  0x90   : > { %973 = vmatpush3.msra.mxu0 %v600_v32  ;;  %1008 = vmatpush3.msra.mxu1 %v632_v33 }
  0x91   : > { %974 = vmatprep.subr.mxu0 %v615_v34  ;;  %1009 = vmatprep.subr.mxu1 %v647_v35 }
  0x92   : > { %975 = vmatpush3.msra.mxu0 %v599_v36  ;;  %1010 = vmatpush3.msra.mxu1 %v631_v37 }
  0x93   : > { %976 = vmatprep.subr.mxu0 %v614_v38  ;;  %1011 = vmatprep.subr.mxu1 %v646_v39 }
  0x94   : > { %977 = vmatpush3.msra.mxu0 %v598_v40  ;;  %1012 = vmatpush3.msra.mxu1 %v630_v41 }
  0x95   : > { %978 = vmatprep.subr.mxu0 %v613_v42  ;;  %1013 = vmatprep.subr.mxu1 %v645_v43 }
  0x96   : > { %979 = vmatpush3.msra.mxu0 %v597_v44  ;;  %1014 = vmatpush3.msra.mxu1 %v629_v45 }
  0x97   : > { %980 = vmatprep.subr.mxu0 %v612_v46  ;;  %1015 = vmatprep.subr.mxu1 %v644_v47 }
  0x98   : > { %981 = vmatpush3.msra.mxu0 %v596_v48  ;;  %1016 = vmatpush3.msra.mxu1 %v628_v49 }
  0x99   : > { %982 = vmatprep.subr.mxu0 %v611_v50  ;;  %1017 = vmatprep.subr.mxu1 %v643_v51 }
  0x9a   : > { %983 = vmatpush3.msra.mxu0 %v595_v52  ;;  %1018 = vmatpush3.msra.mxu1 %v627_v53 }
  0x9b   : > { %984 = vmatprep.subr.mxu0 %v610_v54  ;;  %1019 = vmatprep.subr.mxu1 %v642_v55 }
  0x9c   : > { %985 = vmatpush3.msra.mxu0 %v594_v56  ;;  %1020 = vmatpush3.msra.mxu1 %v626_v57 }
  0x9d   : > { %986 = vmatprep.subr.mxu0 %v609_v58  ;;  %1021 = vmatprep.subr.mxu1 %v641_v59 }
  0x9e   : > { %987 = vmatpush3.msra.mxu0 %v593_v60  ;;  %1022 = vmatpush3.msra.mxu1 %v625_v61 }
  0x9f   : > { %988 = vmatprep.subr.mxu0 %v608_v62  ;;  %1023 = vmatprep.subr.mxu1 %v640_v63  ;;  %v953_v63 = vld [vmem:[%s1570_s4] ss:$0 sm:$0xff] }
  0xa0   : > { %989 = vmatpush3.msra.mxu0 %v592_v0  ;;  %1024 = vmatpush3.msra.mxu1 %v624_v1 }
 0x140   : > { %v479_v11 = vpop.f32.mrf.mxu0  ;;  %v550_v12 = vpop.f32.mrf.mxu1 }
 0x141   : > { %v480_v15 = vadd.f32 %v479_v11, %v396_v9  ;;  %v551_v16 = vadd.f32 %v550_v12, %v404_v10 }
 0x142   : > { %v481_v17 = vpop.f32.mrf.mxu0  ;;  %v552_v18 = vpop.f32.mrf.mxu1 }
 0x143   : > { %v559_v19 = vmul.f32 %v480_v15, %v480_v15  ;;  %v561_v20 = vmul.f32 %v551_v16, %v551_v16  ;;  %v482_v21 = vadd.f32 %v481_v17, %v400_v13  ;;  %v553_v22 = vadd.f32 %v552_v18, %v408_v14 }
 0x144   : > { %v555_v49 = vmul.f32 0.5, %v480_v15  ;;  %v557_v52 = vmul.f32 0.5, %v551_v16 }
 0x145   : > { %v563_v23 = vmul.f32 %v559_v19, %v480_v15  ;;  %v565_v24 = vmul.f32 %v561_v20, %v551_v16  ;;  %v560_v25 = vmul.f32 %v482_v21, %v482_v21  ;;  %v562_v26 = vmul.f32 %v553_v22, %v553_v22 }
 0x146   : > { %v556_v46 = vmul.f32 0.5, %v482_v21  ;;  %v558_v50 = vmul.f32 0.5, %v553_v22 }
 0x147   : > { %v567_v27 = vmul.f32 0.044715, %v563_v23  ;;  %v569_v28 = vmul.f32 0.044715, %v565_v24  ;;  %v564_v29 = vmul.f32 %v560_v25, %v482_v21  ;;  %v566_v30 = vmul.f32 %v562_v26, %v553_v22 }
 0x149   : > { %v571_v31 = vadd.f32 %v567_v27, %v480_v15  ;;  %v573_v32 = vadd.f32 %v569_v28, %v551_v16  ;;  %v568_v33 = vmul.f32 0.044715, %v564_v29  ;;  %v570_v34 = vmul.f32 0.044715, %v566_v30 }
 0x14b   : > { %v575_v35 = vmul.f32 0.7978846, %v571_v31  ;;  %v577_v36 = vmul.f32 0.7978846, %v573_v32  ;;  %v572_v37 = vadd.f32 %v568_v33, %v482_v21  ;;  %v574_v38 = vadd.f32 %v570_v34, %v553_v22 }
 0x14d   : > { %1126 = vtanh.f32 %v575_v35  ;;  %v576_v39 = vmul.f32 0.7978846, %v572_v37  ;;  %v578_v40 = vmul.f32 0.7978846, %v574_v38 }
 0x14e   : > { %1128 = vtanh.f32 %v577_v36 }
 0x14f   : > { %1130 = vtanh.f32 %v576_v39 }
 0x150   : > { %1132 = vtanh.f32 %v578_v40 }
 0x15a   : > { %v1127_v41 = vpop.eup %1126 }
 0x15b   : > { %v1129_v42 = vpop.eup %1128  ;;  %v583_v44 = vadd.f32 1.0, %v1127_v41 }
 0x15c   : > { %v1131_v43 = vpop.eup %1130  ;;  %v585_v48 = vadd.f32 1.0, %v1129_v42 }
 0x15d   : > { %v1133_v45 = vpop.eup %1132  ;;  %v584_v47 = vadd.f32 1.0, %v1131_v43  ;;  %v587_v55 = vmul.f32 %v583_v44, %v555_v49 }
 0x15e   : > { %v586_v51 = vadd.f32 1.0, %v1133_v45  ;;  %v589_v56 = vmul.f32 %v585_v48, %v557_v52 }
 0x15f   : > { %v588_v53 = vmul.f32 %v584_v47, %v556_v46 }
 0x160   : > { %v590_v54 = vmul.f32 %v586_v51, %v558_v50 }
 0x161   : > { %720 = vmatprep.mubr.f32.mxu0 %v588_v53 }
 0x162   : > { %790 = vmatprep.mubr.f32.mxu1 %v590_v54  ;;  %721 = vmatmul.mubr.f32.vlgmr.msra.gmra.mxu0 %v587_v55 }
 0x163   : > { %791 = vmatmul.mubr.f32.vlgmr.msra.gmra.mxu1 %v589_v56 }
 0x222   : > { %v990_v57 = vpop.f32.mrf.mxu0 }
 0x223   : > { %v1025_v58 = vpop.f32.mrf.mxu1 }
 0x224   : > { %v991_v59 = vpop.f32.mrf.mxu0 }
 0x225   : > { %v992_v60 = vadd.f32 %v991_v59, %v990_v57  ;;  %v1026_v61 = vpop.f32.mrf.mxu1 }
 0x226   : > { %v1027_v62 = vadd.f32 %v1026_v61, %v1025_v58 }
 0x228   : > { %v793_v0 = vadd.f32 %v1027_v62, %v992_v60 }
 0x22a   : > { %v809_v1 = vadd.f32 %v953_v63, %v793_v0 }
 0x22c   : > { %810 = vst [vmem:[%s317_s7] sm:$0xff] %v809_v1 }
 0x22d   : > { %1253 = shalt.err (!%p1250_p13)
}
 0x22e   : > { %s1254_s12 = scalar_lea.hbm %s823_s11, 128  ;;  %s1258_s1 = scalar_lea.hbm %s1571_s5, 256 }
 0x22f   : > { %p1255_p1 = scmp.ne.s32.totalorder %s823_s11, %s1254_s12  ;;  %p1259_p12 = scmp.lt.s32.totalorder %s823_s11, %s1571_s5 }
 0x230   : > { %p1260_p5 = scmp.lt.s32.totalorder %s1258_s1, %s1254_s12 }
 0x231   : > { %p1256_p4 = pnand %p1255_p1, %p1470_p0 }
 0x232   : > { %p1261_p3 = por %p1260_p5, %p1259_p12 }
 0x233   : > { %p1257_p8 = pneg %p1256_p4 }
 0x235   : > { %p1262_p10 = pnand %p1261_p3, %p1257_p8 }
 0x237   : > { %1265 = shalt.err (!%p1262_p10)
}
 0x238   : > { %1042 = dma.vmem_to_hbm [thread:$0]  (%p1470_p0), %s826_s27, 128, %s823_s11, %s812_s13  }
 0x239 PF: > { %s837_s30 = sand.u32 1, %s1308_s18   ;;  %p1589_p2 = scmp.ne.s32.totalorder %s1580_s29, 0 }
 0x23a   : > { %p1590_p11 = scmp.ge.s32.totalorder %s1328_s23, 2  ;;  %s838_s7 = scalar_lea.sflag [#allocation5], %s837_s30 }
 0x23c   : > { %p1059_p7 = pnand %p1590_p11, %p1589_p2 }
 0x23e   : > { %p1060_p6 = pneg %p1059_p7 }
 0x240   : > { %1303 = dma.done.wait (%p1060_p6), %s838_s7, 128  }
 0x241   : > { %1305 = vsyncadd (%p1060_p6), %s838_s7, 4294967168  ;;  %s23_s23 = sadd.s32 1, %s1328_s23   ;;  %s1591_s18 = smov %s1312_s19 }
 0x242   : > { %p20_p9 = scmp.ge.s32.totalorder %s23_s23, 4   ;;  %s1592_s19 = smov %s1316_s20 }
 0x243   : > { %s1593_s20 = smov %s1482_s25  ;;  %s1594_s21 = smov %s1324_s22 }
 0x244   : > { %s1595_s22 = smov %s1597_s15  ;;  %22 = sbr.rel (!%p20_p9) target bundleno = 10 (0xa), region = 108 }
 0x249   :  { %843 = vsyncpa [#allocation4], 1 }
 0x24a   :  { %845 = vsyncpa [#allocation4 + $0x1], 1 }
 0x24b   :  { %846 = vsyncpa [#allocation7], 1 }
 0x24c   :  { %847 = vsyncpa [#allocation10], 1 }
 0x24d   :  { %848 = vsyncpa [#allocation5], 1 }
 0x24e   :  { %850 = vsyncpa [#allocation5 + $0x1], 1 }

</bundles_post_ra>
